<compile_context>
chip_gen: v6e
topology: v6e:2x2x1
jax: 0.10.0
libtpu: 0.0.40
codegen_flags: <defaults>
</compile_context>

<pallas_src>
import jax
import jax.numpy as jnp
from jax.experimental import pallas as pl
from jax.experimental.pallas import tpu as pltpu


def _round_up(n, m):
    return ((n + m - 1) // m) * m


def _mlp_kernel(x_ref, w1_ref, b1_ref, w2_ref, b2_ref, o_ref):
    # x_ref: (TM, d0) native dtype; w*: bf16; b*: (1, d*) f32; o_ref: (TM, d2) f32.
    x = x_ref[...].astype(jnp.bfloat16)               # in-kernel cast (VPU, hidden under MXU)
    h = jnp.dot(x, w1_ref[...], preferred_element_type=jnp.float32)
    h = jnp.maximum(h + b1_ref[...], 0.0)             # f32 bias-add + ReLU epilogue
    h = h.astype(jnp.bfloat16)                        # bf16 into second MXU pass
    y = jnp.dot(h, w2_ref[...], preferred_element_type=jnp.float32)
    o_ref[...] = y + b2_ref[...]                      # f32 output (torch: x.float())


def prepare_params(w1, b1, w2, b2):
    """Pad/cast the weights ONCE (hoisted out of the per-call path).

    w1: (d0, d1), b1: (d1,)   -- first Linear (transposed vs torch storage)
    w2: (d1, d2), b2: (d2,)   -- second Linear
    Only the internal hidden dim d1 is padded (to a multiple of 128); the
    zero-padded columns/rows contribute exactly 0 through ReLU and matmul.
    """
    d0, d1 = w1.shape
    d2 = w2.shape[1]
    d1p = _round_up(d1, 128)

    w1b = w1.astype(jnp.bfloat16)
    w2b = w2.astype(jnp.bfloat16)
    if d1p != d1:
        w1p = jnp.zeros((d0, d1p), jnp.bfloat16).at[:, :d1].set(w1b)
        w2p = jnp.zeros((d1p, d2), jnp.bfloat16).at[:d1, :].set(w2b)
        b1p = jnp.zeros((1, d1p), jnp.float32).at[0, :d1].set(b1.astype(jnp.float32))
    else:
        w1p, w2p = w1b, w2b
        b1p = b1.astype(jnp.float32).reshape(1, d1)
    b2p = b2.astype(jnp.float32).reshape(1, d2)
    return (w1p, b1p, w2p, b2p, (d0, d1, d2))


def simple_mlp_forward(x, params, *, tm_max=1024):
    """Fused MLP forward.  `params` comes from prepare_params (cached weights)."""
    w1p, b1p, w2p, b2p, (d0, d1, d2) = params

    if x.ndim == 1:                           # torch parity: only flattens 1-D inputs
        x = x.reshape(x.shape[0], -1)
    if not jnp.issubdtype(x.dtype, jnp.floating):
        x = x.astype(jnp.float32)             # torch: x.float()

    B = x.shape[0]
    assert x.shape[1] == d0
    d1p = w1p.shape[1]
    xb = x.dtype.itemsize

    # Resident (single-buffered) weight footprint.
    weight_bytes = (w1p.size * w1p.dtype.itemsize + w2p.size * w2p.dtype.itemsize
                    + b1p.size * 4 + b2p.size * 4)

    # Per-generation VMEM capacity (v5e/v6e: 128 MiB, v7x: 64 MiB).
    vmem_cap = 64 << 20
    try:
        vmem_cap = int(getattr(pltpu.get_tpu_info(), "vmem_capacity_bytes", vmem_cap))
    except Exception:
        pass
    budget = int(vmem_cap * 0.8)

    def footprint(tm):
        return (2 * tm * d0 * xb              # x tiles, native dtype, double-buffered
                + 2 * tm * d2 * 4             # f32 out tiles, double-buffered
                + weight_bytes                # resident weights, single-buffered
                + tm * d0 * 2                 # bf16 copy of the x tile
                + tm * d1p * (4 + 2))         # f32 h + bf16 h intermediates

    # Largest batch tile (multiple of 16 for bf16 sublane packing) that fits.
    TM = min(_round_up(B, 16), _round_up(tm_max, 16))
    while TM > 16 and footprint(TM) > budget:
        TM = max(16, _round_up(TM // 2, 16))
    # v7x megacore: make sure a big batch produces >= 2 grid steps.
    if B >= 512 and TM >= B:
        TM = _round_up((B + 1) // 2, 16)
    # TODO(synk): add a d1/d2-tiled fallback (pl.when init/finalize accumulator)
    # for weights too large to stay VMEM-resident.

    Bp = _round_up(B, TM)
    xp = x if Bp == B else jnp.zeros((Bp, d0), x.dtype).at[:B, :].set(x)

    # Accurate footprint + ~20% headroom, capped below physical capacity.
    vmem_limit = int(min(max(int(footprint(TM) * 1.2), 32 << 20),
                         int(vmem_cap * 0.9)))

    ce = pl.CostEstimate(flops=2 * B * (d0 * d1 + d1 * d2),
                         transcendentals=0,
                         bytes_accessed=B * d0 * xb + weight_bytes + B * d2 * 4)

    def build(single_buffer_weights):
        wkw = dict(pipeline_mode=pl.Buffered(1)) if single_buffer_weights else {}
        in_specs = [
            pl.BlockSpec((TM, d0), lambda i: (i, 0)),            # x streamed per tile
            pl.BlockSpec((d0, d1p), lambda i: (0, 0), **wkw),    # resident weights
            pl.BlockSpec((1, d1p), lambda i: (0, 0), **wkw),
            pl.BlockSpec((d1p, d2), lambda i: (0, 0), **wkw),    # resident weights
            pl.BlockSpec((1, d2), lambda i: (0, 0), **wkw),
        ]
        out_specs = pl.BlockSpec((TM, d2), lambda i: (i, 0))     # unpadded d2 block
        return pl.pallas_call(
            _mlp_kernel,
            out_shape=jax.ShapeDtypeStruct((Bp, d2), jnp.float32),
            grid_spec=pltpu.PrefetchScalarGridSpec(
                num_scalar_prefetch=0,
                grid=(Bp // TM,),
                in_specs=in_specs,
                out_specs=out_specs,
            ),
            compiler_params=pltpu.CompilerParams(
                dimension_semantics=("parallel",),    # batch tiles -> both TCs on v7x
                vmem_limit_bytes=vmem_limit),
            cost_estimate=ce,
        )

    try:
        out = jax.block_until_ready(build(True)(xp, w1p, b1p, w2p, b2p))
    except Exception:
        # Fallback for jax builds without BlockSpec(pipeline_mode=...) support.
        out = jax.block_until_ready(build(False)(xp, w1p, b1p, w2p, b2p))

    return out if Bp == B else out[:B]


def init_params(key, dims):
    """Deterministic xavier-normal-ish init, nn.Linear-equivalent shapes.

    Torch stores W as (out, in); we store the transpose (in, out).
    """
    d0, d1, d2 = dims
    k1, k2, k3, k4 = jax.random.split(key, 4)
    std1 = (2.0 / (d0 + d1)) ** 0.5
    std2 = (2.0 / (d1 + d2)) ** 0.5
    w1 = jax.random.normal(k1, (d0, d1), jnp.float32) * std1
    b1 = jax.random.normal(k2, (d1,), jnp.float32) * 0.01
    w2 = jax.random.normal(k3, (d1, d2), jnp.float32) * std2
    b2 = jax.random.normal(k4, (d2,), jnp.float32) * 0.01
    return w1, b1, w2, b2


if __name__ == "__main__":
    dims = [16, 32, 8]          # [d_in, d_hidden, d_out]
    batch = 8

    key = jax.random.PRNGKey(0)
    kx, kp = jax.random.split(key)
    x = jax.random.normal(kx, (batch, dims[0]), jnp.float32)
    w1, b1, w2, b2 = init_params(kp, dims)

    params = prepare_params(w1, b1, w2, b2)   # pad + bf16-cast once (cached)

    out = simple_mlp_forward(x, params)
    out = jax.block_until_ready(out)
    assert out.shape == (batch, dims[2])
    assert out.dtype == jnp.float32

    # Reference matching the kernel's bf16-input / f32-accumulate recipe.
    xr = x.astype(jnp.bfloat16).astype(jnp.float32)
    w1r = w1.astype(jnp.bfloat16).astype(jnp.float32)
    w2r = w2.astype(jnp.bfloat16).astype(jnp.float32)
    h = jnp.maximum(xr @ w1r + b1, 0.0)
    h = h.astype(jnp.bfloat16).astype(jnp.float32)
    ref_bf16 = h @ w2r + b2
    assert jnp.allclose(out, ref_bf16, atol=1e-2, rtol=1e-2)

    # Loose check against the pure-f32 PyTorch-semantics reference.
    ref_f32 = jnp.maximum(x @ w1 + b1, 0.0) @ w2 + b2
    assert jnp.allclose(out, ref_f32, atol=5e-2, rtol=5e-2)

    print("KERNEL_OK")
</pallas_src>

<mosaic_0001>
module attributes {stable_mosaic.version = 11 : i64} {
  func.func @_mlp_kernel(%arg0: i32, %arg1: memref<16x16xf32, #tpu.memory_space<vmem>>, %arg2: memref<16x128xbf16, #tpu.memory_space<vmem>>, %arg3: memref<1x128xf32, #tpu.memory_space<vmem>>, %arg4: memref<128x8xbf16, #tpu.memory_space<vmem>>, %arg5: memref<1x8xf32, #tpu.memory_space<vmem>>, %arg6: memref<16x8xf32, #tpu.memory_space<vmem>>) attributes {dimension_semantics = [#tpu.dimension_semantics<parallel>], iteration_bounds = array<i64: 1>, scalar_prefetch = 0 : i64, scratch_operands = 0 : i64, tpu.core_type = #tpu.core_type<tc>, window_params = [{transform_indices = @transform_0, window_bounds = array<i64: 16, 16>}, {pipeline_mode = #tpu.pipeline_mode<synchronous>, transform_indices = @transform_1, window_bounds = array<i64: 16, 128>}, {pipeline_mode = #tpu.pipeline_mode<synchronous>, transform_indices = @transform_2, window_bounds = array<i64: 1, 128>}, {pipeline_mode = #tpu.pipeline_mode<synchronous>, transform_indices = @transform_3, window_bounds = array<i64: 128, 8>}, {pipeline_mode = #tpu.pipeline_mode<synchronous>, transform_indices = @transform_4, window_bounds = array<i64: 1, 8>}, {transform_indices = @transform_5, window_bounds = array<i64: 16, 8>}]} {
    %c0 = arith.constant 0 : index
    %c0_0 = arith.constant 0 : index
    %0 = vector.load %arg1[%c0, %c0_0] : memref<16x16xf32, #tpu.memory_space<vmem>>, vector<16x16xf32>
    %1 = arith.truncf %0 : vector<16x16xf32> to vector<16x16xbf16>
    %c0_1 = arith.constant 0 : index
    %c0_2 = arith.constant 0 : index
    %2 = vector.load %arg2[%c0_1, %c0_2] : memref<16x128xbf16, #tpu.memory_space<vmem>>, vector<16x128xbf16>
    %cst = arith.constant dense<0.000000e+00> : vector<16x128xf32>
    %3 = tpu.matmul %1, %2, %cst {dimension_numbers = #tpu.dot_dimension_numbers<[1], [0], [0], [1], [0, 0, 1, 1], [], []>} : vector<16x16xbf16>, vector<16x128xbf16>, vector<16x128xf32> -> vector<16x128xf32>
    %c0_3 = arith.constant 0 : index
    %c0_4 = arith.constant 0 : index
    %4 = vector.load %arg3[%c0_3, %c0_4] : memref<1x128xf32, #tpu.memory_space<vmem>>, vector<1x128xf32>
    %5 = vector.broadcast %4 : vector<1x128xf32> to vector<16x128xf32>
    %6 = arith.addf %3, %5 : vector<16x128xf32>
    %cst_5 = arith.constant 0.000000e+00 : f32
    %7 = vector.broadcast %cst_5 : f32 to vector<16x128xf32>
    %8 = arith.maximumf %6, %7 : vector<16x128xf32>
    %9 = arith.truncf %8 : vector<16x128xf32> to vector<16x128xbf16>
    %c0_6 = arith.constant 0 : index
    %c0_7 = arith.constant 0 : index
    %10 = vector.load %arg4[%c0_6, %c0_7] : memref<128x8xbf16, #tpu.memory_space<vmem>>, vector<128x8xbf16>
    %cst_8 = arith.constant dense<0.000000e+00> : vector<16x8xf32>
    %11 = tpu.matmul %9, %10, %cst_8 {dimension_numbers = #tpu.dot_dimension_numbers<[1], [0], [0], [1], [0, 0, 1, 1], [], []>} : vector<16x128xbf16>, vector<128x8xbf16>, vector<16x8xf32> -> vector<16x8xf32>
    %c0_9 = arith.constant 0 : index
    %c0_10 = arith.constant 0 : index
    %12 = vector.load %arg5[%c0_9, %c0_10] : memref<1x8xf32, #tpu.memory_space<vmem>>, vector<1x8xf32>
    %13 = vector.broadcast %12 : vector<1x8xf32> to vector<16x8xf32>
    %14 = arith.addf %11, %13 : vector<16x8xf32>
    %c0_11 = arith.constant 0 : index
    %c0_12 = arith.constant 0 : index
    %15 = vector.load %arg6[%c0_11, %c0_12] : memref<16x8xf32, #tpu.memory_space<vmem>>, vector<16x8xf32>
    tpu.vector_store %arg6[%c0_11, %c0_12], %14 {strides = array<i32>} : memref<16x8xf32, #tpu.memory_space<vmem>>, vector<16x8xf32>,
    return
  }
  func.func @transform_0(%arg0: i32) -> (i32, i32) {
    %c0_i32 = arith.constant 0 : i32
    %c0_i32_0 = arith.constant 0 : i32
    return %arg0, %c0_i32 : i32, i32
  }
  func.func @transform_1(%arg0: i32) -> (i32, i32) {
    %c0_i32 = arith.constant 0 : i32
    %c0_i32_0 = arith.constant 0 : i32
    %c0_i32_1 = arith.constant 0 : i32
    return %c0_i32, %c0_i32_0 : i32, i32
  }
  func.func @transform_2(%arg0: i32) -> (i32, i32) {
    %c0_i32 = arith.constant 0 : i32
    %c0_i32_0 = arith.constant 0 : i32
    %c0_i32_1 = arith.constant 0 : i32
    return %c0_i32, %c0_i32_0 : i32, i32
  }
  func.func @transform_3(%arg0: i32) -> (i32, i32) {
    %c0_i32 = arith.constant 0 : i32
    %c0_i32_0 = arith.constant 0 : i32
    %c0_i32_1 = arith.constant 0 : i32
    return %c0_i32, %c0_i32_0 : i32, i32
  }
  func.func @transform_4(%arg0: i32) -> (i32, i32) {
    %c0_i32 = arith.constant 0 : i32
    %c0_i32_0 = arith.constant 0 : i32
    %c0_i32_1 = arith.constant 0 : i32
    return %c0_i32, %c0_i32_0 : i32, i32
  }
  func.func @transform_5(%arg0: i32) -> (i32, i32) {
    %c0_i32 = arith.constant 0 : i32
    %c0_i32_0 = arith.constant 0 : i32
    return %arg0, %c0_i32 : i32, i32
  }
}

module attributes {stable_mosaic.version = 11 : i64} {
  func.func @_mlp_kernel(%arg0: i32, %arg1: memref<16x16xf32, #tpu.memory_space<vmem>>, %arg2: memref<16x128xbf16, #tpu.memory_space<vmem>>, %arg3: memref<1x128xf32, #tpu.memory_space<vmem>>, %arg4: memref<128x8xbf16, #tpu.memory_space<vmem>>, %arg5: memref<1x8xf32, #tpu.memory_space<vmem>>, %arg6: memref<16x8xf32, #tpu.memory_space<vmem>>) attributes {dimension_semantics = [#tpu.dimension_semantics<parallel>], iteration_bounds = array<i64: 1>, scalar_prefetch = 0 : i64, scratch_operands = 0 : i64, tpu.core_type = #tpu.core_type<tc>, window_params = [{transform_indices = @transform_0, window_bounds = array<i64: 16, 16>}, {pipeline_mode = #tpu.pipeline_mode<synchronous>, transform_indices = @transform_1, window_bounds = array<i64: 16, 128>}, {pipeline_mode = #tpu.pipeline_mode<synchronous>, transform_indices = @transform_2, window_bounds = array<i64: 1, 128>}, {pipeline_mode = #tpu.pipeline_mode<synchronous>, transform_indices = @transform_3, window_bounds = array<i64: 128, 8>}, {pipeline_mode = #tpu.pipeline_mode<synchronous>, transform_indices = @transform_4, window_bounds = array<i64: 1, 8>}, {transform_indices = @transform_5, window_bounds = array<i64: 16, 8>}]} {
    %c0 = arith.constant 0 : index
    %c0_0 = arith.constant 0 : index
    %0 = vector.load %arg1[%c0, %c0_0] : memref<16x16xf32, #tpu.memory_space<vmem>>, vector<16x16xf32>
    %1 = arith.truncf %0 : vector<16x16xf32> to vector<16x16xbf16>
    %c0_1 = arith.constant 0 : index
    %c0_2 = arith.constant 0 : index
    %2 = vector.load %arg2[%c0_1, %c0_2] : memref<16x128xbf16, #tpu.memory_space<vmem>>, vector<16x128xbf16>
    %cst = arith.constant dense<0.000000e+00> : vector<16x128xf32>
    %3 = tpu.matmul %1, %2, %cst {dimension_numbers = #tpu.dot_dimension_numbers<[1], [0], [0], [1], [0, 0, 1, 1], [], []>} : vector<16x16xbf16>, vector<16x128xbf16>, vector<16x128xf32> -> vector<16x128xf32>
    %c0_3 = arith.constant 0 : index
    %c0_4 = arith.constant 0 : index
    %4 = vector.load %arg3[%c0_3, %c0_4] : memref<1x128xf32, #tpu.memory_space<vmem>>, vector<1x128xf32>
    %5 = vector.broadcast %4 : vector<1x128xf32> to vector<16x128xf32>
    %6 = arith.addf %3, %5 : vector<16x128xf32>
    %cst_5 = arith.constant 0.000000e+00 : f32
    %7 = vector.broadcast %cst_5 : f32 to vector<16x128xf32>
    %8 = arith.maximumf %6, %7 : vector<16x128xf32>
    %9 = arith.truncf %8 : vector<16x128xf32> to vector<16x128xbf16>
    %c0_6 = arith.constant 0 : index
    %c0_7 = arith.constant 0 : index
    %10 = vector.load %arg4[%c0_6, %c0_7] : memref<128x8xbf16, #tpu.memory_space<vmem>>, vector<128x8xbf16>
    %cst_8 = arith.constant dense<0.000000e+00> : vector<16x8xf32>
    %11 = tpu.matmul %9, %10, %cst_8 {dimension_numbers = #tpu.dot_dimension_numbers<[1], [0], [0], [1], [0, 0, 1, 1], [], []>} : vector<16x128xbf16>, vector<128x8xbf16>, vector<16x8xf32> -> vector<16x8xf32>
    %c0_9 = arith.constant 0 : index
    %c0_10 = arith.constant 0 : index
    %12 = vector.load %arg5[%c0_9, %c0_10] : memref<1x8xf32, #tpu.memory_space<vmem>>, vector<1x8xf32>
    %13 = vector.broadcast %12 : vector<1x8xf32> to vector<16x8xf32>
    %14 = arith.addf %11, %13 : vector<16x8xf32>
    %c0_11 = arith.constant 0 : index
    %c0_12 = arith.constant 0 : index
    %15 = vector.load %arg6[%c0_11, %c0_12] : memref<16x8xf32, #tpu.memory_space<vmem>>, vector<16x8xf32>
    tpu.vector_store %arg6[%c0_11, %c0_12], %14 {strides = array<i32>} : memref<16x8xf32, #tpu.memory_space<vmem>>, vector<16x8xf32>,
    return
  }
  func.func @transform_0(%arg0: i32) -> (i32, i32) {
    %c0_i32 = arith.constant 0 : i32
    %c0_i32_0 = arith.constant 0 : i32
    return %arg0, %c0_i32 : i32, i32
  }
  func.func @transform_1(%arg0: i32) -> (i32, i32) {
    %c0_i32 = arith.constant 0 : i32
    %c0_i32_0 = arith.constant 0 : i32
    %c0_i32_1 = arith.constant 0 : i32
    return %c0_i32, %c0_i32_0 : i32, i32
  }
  func.func @transform_2(%arg0: i32) -> (i32, i32) {
    %c0_i32 = arith.constant 0 : i32
    %c0_i32_0 = arith.constant 0 : i32
    %c0_i32_1 = arith.constant 0 : i32
    return %c0_i32, %c0_i32_0 : i32, i32
  }
  func.func @transform_3(%arg0: i32) -> (i32, i32) {
    %c0_i32 = arith.constant 0 : i32
    %c0_i32_0 = arith.constant 0 : i32
    %c0_i32_1 = arith.constant 0 : i32
    return %c0_i32, %c0_i32_0 : i32, i32
  }
  func.func @transform_4(%arg0: i32) -> (i32, i32) {
    %c0_i32 = arith.constant 0 : i32
    %c0_i32_0 = arith.constant 0 : i32
    %c0_i32_1 = arith.constant 0 : i32
    return %c0_i32, %c0_i32_0 : i32, i32
  }
  func.func @transform_5(%arg0: i32) -> (i32, i32) {
    %c0_i32 = arith.constant 0 : i32
    %c0_i32_0 = arith.constant 0 : i32
    return %arg0, %c0_i32 : i32, i32
  }
}

</mosaic_0001>

<bundles_post_ra>
// kernel: tpu_custom_call.1
= control target key start
LH: loop header
LB: loop body
LE: loop exit
PB: predicated region body
PF: predicated region fallthrough
CT: control target
= control target key end

     0   :  { %v266_v0 = vmov 0.0   ;;  %vm267_vm0 = vmmov 0   ;;  %vm39_vm1 = vcmask 130048   ;;  %vm199_vm2 = vcmask 64512   ;;  %s343_s1 = inlined_call_operand.vmem [shape: bf16[16,128], index: 1, kind: input, shape index: {}]   ;;  %s344_s0 = inlined_call_operand.vmem [shape: f32[16,16], index: 0, kind: input, shape index: {}]   ;;  %s345_s3 = inlined_call_operand.vmem [shape: bf16[128,8], index: 3, kind: input, shape index: {}]   ;;  %s346_s2 = inlined_call_operand.vmem [shape: f32[1,128], index: 2, kind: input, shape index: {}]   ;;  %s347_s4 = inlined_call_operand.vmem [shape: f32[1,8], index: 4, kind: input, shape index: {}]   ;;  %s348_s5 = inlined_call_operand.vmem [shape: f32[16,8], index: 5, kind: output, shape index: {}]  }
   0x1   :  { %229 = vmatprep.subr.bf16.mxu0 %v266_v0  ;;  %v257_v1 = vld [vmem:[%s343_s1] sm:$0xff]   ;;  %231 = vmatprep.mubr.msk.bf16.mxu0 %vm267_vm0, %v266_v0  ;;  %v22_v3 = vld [vmem:[%s344_s0 + $0x8] sm:$0xff]  ;;  %v258_v5 = vld [vmem:[%s345_s3 + $0x38] sm:$0xff]  }
   0x2   :  { %v21_v2 = vld [vmem:[%s344_s0] sm:$0xff]  ;;  %235 = vmatprep.subr.bf16.mxu1 %v266_v0  ;;  %251 = vmatprep.mubr.msk.bf16.mxu1 %vm267_vm0, %v266_v0  ;;  %v259_v6 = vld [vmem:[%s345_s3 + $0x30] sm:$0xff]   ;;  %v260_v7 = vld [vmem:[%s345_s3 + $0x28] sm:$0xff]  }
   0x3   :  { %230 = vmatpush3.bf16.msra.mxu0 %v257_v1  ;;  %v23_v4 = vpack.c.bf16 %v22_v3, %v21_v2  ;;  %236 = vmatpush3.bf16.msra.mxu1 %v258_v5  ;;  %v261_v8 = vld [vmem:[%s345_s3 + $0x20] sm:$0xff]   ;;  %v262_v9 = vld [vmem:[%s345_s3 + $0x18] sm:$0xff]   ;;  %v263_v10 = vld [vmem:[%s345_s3 + $0x10] sm:$0xff]  }
   0x4   :  { %237 = vmatprep.subr.bf16.mxu1 %v266_v0  ;;  %v264_v11 = vld [vmem:[%s345_s3 + $0x8] sm:$0xff]   ;;  %v265_v12 = vld [vmem:[%s345_s3] sm:$0xff]  }
   0x5   :  { %v206_v13 = vld [vmem:[%s346_s2] ss:$0 sm:$0xff] }
   0x6   :  { %232 = vmatmul.mubr.msk.bf16.vlgmr.msra.gmra.mxu0 %vm39_vm1, %v23_v4  ;;  %v209_v23 = vld [vmem:[%s347_s4] ss:$0 sm:$0xff] }
   0x7   :  { %238 = vmatpush3.bf16.msra.mxu1 %v259_v6 }
   0x8   :  { %239 = vmatprep.subr.bf16.mxu1 %v266_v0 }
   0xb   :  { %240 = vmatpush3.bf16.msra.mxu1 %v260_v7 }
   0xc   :  { %241 = vmatprep.subr.bf16.mxu1 %v266_v0 }
   0xf   :  { %242 = vmatpush3.bf16.msra.mxu1 %v261_v8 }
  0x10   :  { %243 = vmatprep.subr.bf16.mxu1 %v266_v0 }
  0x13   :  { %244 = vmatpush3.bf16.msra.mxu1 %v262_v9 }
  0x14   :  { %245 = vmatprep.subr.bf16.mxu1 %v266_v0 }
  0x17   :  { %246 = vmatpush3.bf16.msra.mxu1 %v263_v10 }
  0x18   :  { %247 = vmatprep.subr.bf16.mxu1 %v266_v0 }
  0x1b   :  { %248 = vmatpush3.bf16.msra.mxu1 %v264_v11 }
  0x1c   :  { %249 = vmatprep.subr.bf16.mxu1 %v266_v0 }
  0x1f   :  { %250 = vmatpush3.bf16.msra.mxu1 %v265_v12 }
  0xc6   :  { %v77_v14 = vpop.f32.mrf.mxu0 }
  0xc7   :  { %v78_v16 = vadd.f32 %v206_v13, %v77_v14 }
  0xc8   :  { %v233_v15 = vpop.f32.mrf.mxu0 }
  0xc9   :  { %v84_v20 = vmax.f32 %v78_v16, 0.0 }
  0xca   :  { %v80_v17 = vpop.f32.mrf.mxu0 }
  0xcb   :  { %v81_v18 = vadd.f32 %v206_v13, %v80_v17 }
  0xcc   :  { %v234_v19 = vpop.f32.mrf.mxu0 }
  0xcd   :  { %v85_v21 = vmax.f32 %v81_v18, 0.0 }
  0xcf   :  { %v86_v22 = vpack.c.bf16 %v85_v21, %v84_v20 }
  0xd1   :  { %252 = vmatmul.mubr.bf16.vlgmr.msra.gmra.mxu1 %v86_v22 }
 0x191   :  { %v192_v24 = vpop.f32.mrf.mxu1 }
 0x192   :  { %v193_v25 = vadd.f32 %v209_v23, %v192_v24 }
 0x193   :  { %v253_v26 = vpop.f32.mrf.mxu1 }
 0x194   :  { %200 = vst.msk [vmem:[%s348_s5] sm:$0xff] %vm199_vm2, %v193_v25 }
 0x195   :  { %v195_v27 = vpop.f32.mrf.mxu1 }
 0x196   :  { %v196_v28 = vadd.f32 %v209_v23, %v195_v27 }
 0x197   :  { %v254_v29 = vpop.f32.mrf.mxu1 }
 0x198   :  { %201 = vst.msk [vmem:[%s348_s5 + $0x8] sm:$0xff] %vm199_vm2, %v196_v28 }

// kernel: tpu_custom_call.1
= control target key start
LH: loop header
LB: loop body
LE: loop exit
PB: predicated region body
PF: predicated region fallthrough
CT: control target
= control target key end

     0   :  { %v266_v0 = vmov 0.0   ;;  %vm267_vm0 = vmmov 0   ;;  %vm39_vm1 = vcmask 130048   ;;  %vm199_vm2 = vcmask 64512   ;;  %s343_s1 = inlined_call_operand.vmem [shape: bf16[16,128], index: 1, kind: input, shape index: {}]   ;;  %s344_s0 = inlined_call_operand.vmem [shape: f32[16,16], index: 0, kind: input, shape index: {}]   ;;  %s345_s3 = inlined_call_operand.vmem [shape: bf16[128,8], index: 3, kind: input, shape index: {}]   ;;  %s346_s2 = inlined_call_operand.vmem [shape: f32[1,128], index: 2, kind: input, shape index: {}]   ;;  %s347_s4 = inlined_call_operand.vmem [shape: f32[1,8], index: 4, kind: input, shape index: {}]   ;;  %s348_s5 = inlined_call_operand.vmem [shape: f32[16,8], index: 5, kind: output, shape index: {}]  }
   0x1   :  { %229 = vmatprep.subr.bf16.mxu0 %v266_v0  ;;  %v257_v1 = vld [vmem:[%s343_s1] sm:$0xff]   ;;  %231 = vmatprep.mubr.msk.bf16.mxu0 %vm267_vm0, %v266_v0  ;;  %v22_v3 = vld [vmem:[%s344_s0 + $0x8] sm:$0xff]  ;;  %v258_v5 = vld [vmem:[%s345_s3 + $0x38] sm:$0xff]  }
   0x2   :  { %v21_v2 = vld [vmem:[%s344_s0] sm:$0xff]  ;;  %235 = vmatprep.subr.bf16.mxu1 %v266_v0  ;;  %251 = vmatprep.mubr.msk.bf16.mxu1 %vm267_vm0, %v266_v0  ;;  %v259_v6 = vld [vmem:[%s345_s3 + $0x30] sm:$0xff]   ;;  %v260_v7 = vld [vmem:[%s345_s3 + $0x28] sm:$0xff]  }
   0x3   :  { %230 = vmatpush3.bf16.msra.mxu0 %v257_v1  ;;  %v23_v4 = vpack.c.bf16 %v22_v3, %v21_v2  ;;  %236 = vmatpush3.bf16.msra.mxu1 %v258_v5  ;;  %v261_v8 = vld [vmem:[%s345_s3 + $0x20] sm:$0xff]   ;;  %v262_v9 = vld [vmem:[%s345_s3 + $0x18] sm:$0xff]   ;;  %v263_v10 = vld [vmem:[%s345_s3 + $0x10] sm:$0xff]  }
   0x4   :  { %237 = vmatprep.subr.bf16.mxu1 %v266_v0  ;;  %v264_v11 = vld [vmem:[%s345_s3 + $0x8] sm:$0xff]   ;;  %v265_v12 = vld [vmem:[%s345_s3] sm:$0xff]  }
   0x5   :  { %v206_v13 = vld [vmem:[%s346_s2] ss:$0 sm:$0xff] }
   0x6   :  { %232 = vmatmul.mubr.msk.bf16.vlgmr.msra.gmra.mxu0 %vm39_vm1, %v23_v4  ;;  %v209_v23 = vld [vmem:[%s347_s4] ss:$0 sm:$0xff] }
   0x7   :  { %238 = vmatpush3.bf16.msra.mxu1 %v259_v6 }
   0x8   :  { %239 = vmatprep.subr.bf16.mxu1 %v266_v0 }
   0xb   :  { %240 = vmatpush3.bf16.msra.mxu1 %v260_v7 }
   0xc   :  { %241 = vmatprep.subr.bf16.mxu1 %v266_v0 }
   0xf   :  { %242 = vmatpush3.bf16.msra.mxu1 %v261_v8 }
  0x10   :  { %243 = vmatprep.subr.bf16.mxu1 %v266_v0 }
  0x13   :  { %244 = vmatpush3.bf16.msra.mxu1 %v262_v9 }
  0x14   :  { %245 = vmatprep.subr.bf16.mxu1 %v266_v0 }
  0x17   :  { %246 = vmatpush3.bf16.msra.mxu1 %v263_v10 }
  0x18   :  { %247 = vmatprep.subr.bf16.mxu1 %v266_v0 }
  0x1b   :  { %248 = vmatpush3.bf16.msra.mxu1 %v264_v11 }
  0x1c   :  { %249 = vmatprep.subr.bf16.mxu1 %v266_v0 }
  0x1f   :  { %250 = vmatpush3.bf16.msra.mxu1 %v265_v12 }
  0xc6   :  { %v77_v14 = vpop.f32.mrf.mxu0 }
  0xc7   :  { %v78_v16 = vadd.f32 %v206_v13, %v77_v14 }
  0xc8   :  { %v233_v15 = vpop.f32.mrf.mxu0 }
  0xc9   :  { %v84_v20 = vmax.f32 %v78_v16, 0.0 }
  0xca   :  { %v80_v17 = vpop.f32.mrf.mxu0 }
  0xcb   :  { %v81_v18 = vadd.f32 %v206_v13, %v80_v17 }
  0xcc   :  { %v234_v19 = vpop.f32.mrf.mxu0 }
  0xcd   :  { %v85_v21 = vmax.f32 %v81_v18, 0.0 }
  0xcf   :  { %v86_v22 = vpack.c.bf16 %v85_v21, %v84_v20 }
  0xd1   :  { %252 = vmatmul.mubr.bf16.vlgmr.msra.gmra.mxu1 %v86_v22 }
 0x191   :  { %v192_v24 = vpop.f32.mrf.mxu1 }
 0x192   :  { %v193_v25 = vadd.f32 %v209_v23, %v192_v24 }
 0x193   :  { %v253_v26 = vpop.f32.mrf.mxu1 }
 0x194   :  { %200 = vst.msk [vmem:[%s348_s5] sm:$0xff] %vm199_vm2, %v193_v25 }
 0x195   :  { %v195_v27 = vpop.f32.mrf.mxu1 }
 0x196   :  { %v196_v28 = vadd.f32 %v209_v23, %v195_v27 }
 0x197   :  { %v254_v29 = vpop.f32.mrf.mxu1 }
 0x198   :  { %201 = vst.msk [vmem:[%s348_s5 + $0x8] sm:$0xff] %vm199_vm2, %v196_v28 }

</bundles_post_ra>
